<compile_context>
chip_gen: v7x
topology: tpu7x:2x2x1
jax: 0.10.0
libtpu: 0.0.40
codegen_flags: <defaults>
</compile_context>

<pallas_src>
import jax
import jax.numpy as jnp
from jax.experimental import pallas as pl
from jax.experimental.pallas import tpu as pltpu

IMAGE_SIZE = 8
IN_DIM = IMAGE_SIZE * IMAGE_SIZE  # 64
H1 = 64
H2 = 16
OUT = 1
MAX_TILE_B = 4096                 # ~10-20 MB of VMEM buffers worst case; fits all gens
VMEM_LIMIT_BYTES = 48 * 1024 * 1024


def _round_up(n, m):
    return ((n + m - 1) // m) * m


def _mlp_kernel(x_ref, w1_ref, b1_ref, w2_ref, b2_ref, w3t_ref, b3_ref, o_ref):
    # Full MLP for one (TILE_B, 64) batch tile. MXU inputs are bf16 (cast in-kernel,
    # hidden under the DMA); accumulation and all elementwise math stay f32
    # (v5e has no bf16 VPU).
    x = x_ref[...].astype(jnp.bfloat16)                                   # (TILE_B, 64)
    h1 = jnp.dot(x, w1_ref[...], preferred_element_type=jnp.float32) + b1_ref[...]
    h1 = jnp.maximum(h1, 0.0)
    h2 = jnp.dot(h1.astype(jnp.bfloat16), w2_ref[...],
                 preferred_element_type=jnp.float32) + b2_ref[...]
    h2 = jnp.maximum(h2, 0.0)                                             # (TILE_B, 16)
    # Final 16 -> 1 layer: VPU multiply + cross-lane reduce (no padded matmul,
    # no 128-lane output). w3t is the transposed weight, shape (1, 16).
    logits = jnp.sum(h2 * w3t_ref[...], axis=-1, keepdims=True) + b3_ref[0, 0]
    # sigmoid epilogue: exp + approximate reciprocal, both on the EUP.
    o_ref[...] = pl.reciprocal(1.0 + jnp.exp(-logits), approx=True)       # (TILE_B, 1)


def prepare_params(params):
    """One-time conversion to kernel-ready form (hoisted out of the forward path)."""
    w1, b1, w2, b2, w3, b3 = params
    return (
        w1.astype(jnp.bfloat16),                       # (64, 64) bf16
        b1.reshape(1, H1).astype(jnp.float32),         # (1, 64)  f32
        w2.astype(jnp.bfloat16),                       # (64, 16) bf16
        b2.reshape(1, H2).astype(jnp.float32),         # (1, 16)  f32
        w3.reshape(H2, OUT).T.astype(jnp.float32),     # (1, 16)  f32 (transposed)
        b3.reshape(1, 1).astype(jnp.float32),          # (1, 1)   f32 scalar -> SMEM
    )


def discriminator_forward(x, prepared, *, max_tile_b=MAX_TILE_B):
    w1_bf, b1, w2_bf, b2, w3t, b3_s = prepared
    B = x.shape[0]

    # Batch tile: multiple of 8 (sublane granule). For B > 8, aim for >= 2 grid
    # steps so v7x's two TensorCores both get work; cap for VMEM headroom.
    if B <= 8:
        tile_b = B                                    # block == full array dim
    else:
        tile_b = max(8, min(max_tile_b, _round_up(-(-B // 2), 8)))
    grid = (pl.cdiv(B, tile_b),)                      # ragged last tile: masked stores

    flops = 2 * B * (IN_DIM * H1 + H1 * H2 + H2 * OUT)
    bytes_accessed = (
        B * IN_DIM * 4                                # x (f32, read once, in-kernel cast)
        + B * OUT * 4                                 # output (f32)
        + (IN_DIM * H1 + H1 * H2) * 2                 # bf16 weights
        + (H2 * OUT + H1 + H2 + OUT) * 4              # f32 last-layer weight + biases
    )

    out = pl.pallas_call(
        _mlp_kernel,
        out_shape=jax.ShapeDtypeStruct((B, OUT), jnp.float32),
        grid=grid,
        in_specs=[
            pl.BlockSpec((tile_b, IN_DIM), lambda i: (i, 0)),   # x: tiled over batch
            pl.BlockSpec((IN_DIM, H1), lambda i: (0, 0)),       # weights stay resident
            pl.BlockSpec((1, H1), lambda i: (0, 0)),
            pl.BlockSpec((H1, H2), lambda i: (0, 0)),
            pl.BlockSpec((1, H2), lambda i: (0, 0)),
            pl.BlockSpec((1, H2), lambda i: (0, 0)),            # transposed w3
            pl.BlockSpec(memory_space=pltpu.MemorySpace.SMEM),  # scalar b3
        ],
        out_specs=pl.BlockSpec((tile_b, OUT), lambda i: (i, 0)),
        compiler_params=pltpu.CompilerParams(
            dimension_semantics=("parallel",),   # shard batch across v7x's 2 TCs
            vmem_limit_bytes=VMEM_LIMIT_BYTES,
        ),
        cost_estimate=pl.CostEstimate(
            flops=flops,
            transcendentals=2 * B,               # exp + reciprocal per row
            bytes_accessed=bytes_accessed,
        ),
    )(x, w1_bf, b1, w2_bf, b2, w3t, b3_s)

    return out


def init_params(key):
    """Deterministic init mimicking nn.Linear's U(-1/sqrt(fan_in), 1/sqrt(fan_in))."""
    ks = jax.random.split(key, 6)

    def lin(kw, kb, fan_in, fan_out):
        bound = 1.0 / jnp.sqrt(fan_in)
        w = jax.random.uniform(kw, (fan_in, fan_out), jnp.float32, -bound, bound)
        b = jax.random.uniform(kb, (1, fan_out), jnp.float32, -bound, bound)
        return w, b

    w1, b1 = lin(ks[0], ks[1], IN_DIM, H1)
    w2, b2 = lin(ks[2], ks[3], H1, H2)
    w3, b3 = lin(ks[4], ks[5], H2, OUT)
    return (w1, b1, w2, b2, w3, b3)


def reference_forward(x, params):
    w1, b1, w2, b2, w3, b3 = params
    h1 = jnp.maximum(x @ w1 + b1, 0.0)
    h2 = jnp.maximum(h1 @ w2 + b2, 0.0)
    return jax.nn.sigmoid(h2 @ w3 + b3)


if __name__ == "__main__":
    key = jax.random.PRNGKey(0)
    k_x, k_p = jax.random.split(key)
    batch = 12  # not a multiple of 8: exercises the ragged last tile and a 2-step grid
    x = jax.random.normal(k_x, (batch, IN_DIM), dtype=jnp.float32)
    params = init_params(k_p)
    prepared = prepare_params(params)   # one-time, kernel-ready weights

    out = discriminator_forward(x, prepared)
    out = jax.block_until_ready(out)

    ref = reference_forward(x, params)
    assert out.shape == (batch, OUT)
    # bf16 MXU inputs + EUP approx reciprocal -> compare against f32 reference
    # with a tolerance comfortably above the ~1e-3 expected deviation.
    assert jnp.allclose(out, ref, atol=1e-2, rtol=1e-2), float(jnp.max(jnp.abs(out - ref)))
    print("KERNEL_OK")
</pallas_src>

<mosaic_0001>
module attributes {stable_mosaic.version = 11 : i64} {
  func.func @_mlp_kernel(%arg0: i32, %arg1: memref<8x64xf32, #tpu.memory_space<vmem>>, %arg2: memref<64x64xbf16, #tpu.memory_space<vmem>>, %arg3: memref<1x64xf32, #tpu.memory_space<vmem>>, %arg4: memref<64x16xbf16, #tpu.memory_space<vmem>>, %arg5: memref<1x16xf32, #tpu.memory_space<vmem>>, %arg6: memref<1x16xf32, #tpu.memory_space<vmem>>, %arg7: memref<1x1xf32, #tpu.memory_space<smem>>, %arg8: memref<8x1xf32, #tpu.memory_space<vmem>>) attributes {dimension_semantics = [#tpu.dimension_semantics<parallel>], iteration_bounds = array<i64: 2>, scalar_prefetch = 0 : i64, scratch_operands = 0 : i64, tpu.core_type = #tpu.core_type<tc>, window_params = [{transform_indices = @transform_0, window_bounds = array<i64: 8, 64>}, {pipeline_mode = #tpu.pipeline_mode<synchronous>, transform_indices = @transform_1, window_bounds = array<i64: 64, 64>}, {pipeline_mode = #tpu.pipeline_mode<synchronous>, transform_indices = @transform_2, window_bounds = array<i64: 1, 64>}, {pipeline_mode = #tpu.pipeline_mode<synchronous>, transform_indices = @transform_3, window_bounds = array<i64: 64, 16>}, {pipeline_mode = #tpu.pipeline_mode<synchronous>, transform_indices = @transform_4, window_bounds = array<i64: 1, 16>}, {pipeline_mode = #tpu.pipeline_mode<synchronous>, transform_indices = @transform_5, window_bounds = array<i64: 1, 16>}, {transform_indices = @transform_6, window_bounds = array<i64: 1, 1>}, {transform_indices = @transform_7, window_bounds = array<i64: 8, 1>}]} {
    %c0 = arith.constant 0 : index
    %c0_0 = arith.constant 0 : index
    %0 = vector.load %arg1[%c0, %c0_0] : memref<8x64xf32, #tpu.memory_space<vmem>>, vector<8x64xf32>
    %1 = arith.truncf %0 : vector<8x64xf32> to vector<8x64xbf16>
    %c0_1 = arith.constant 0 : index
    %c0_2 = arith.constant 0 : index
    %2 = vector.load %arg2[%c0_1, %c0_2] : memref<64x64xbf16, #tpu.memory_space<vmem>>, vector<64x64xbf16>
    %cst = arith.constant dense<0.000000e+00> : vector<8x64xf32>
    %3 = tpu.matmul %1, %2, %cst {dimension_numbers = #tpu.dot_dimension_numbers<[1], [0], [0], [1], [0, 0, 1, 1], [], []>} : vector<8x64xbf16>, vector<64x64xbf16>, vector<8x64xf32> -> vector<8x64xf32>
    %c0_3 = arith.constant 0 : index
    %c0_4 = arith.constant 0 : index
    %4 = vector.load %arg3[%c0_3, %c0_4] : memref<1x64xf32, #tpu.memory_space<vmem>>, vector<1x64xf32>
    %5 = vector.broadcast %4 : vector<1x64xf32> to vector<8x64xf32>
    %6 = arith.addf %3, %5 : vector<8x64xf32>
    %cst_5 = arith.constant 0.000000e+00 : f32
    %7 = vector.broadcast %cst_5 : f32 to vector<8x64xf32>
    %8 = arith.maximumf %6, %7 : vector<8x64xf32>
    %9 = arith.truncf %8 : vector<8x64xf32> to vector<8x64xbf16>
    %c0_6 = arith.constant 0 : index
    %c0_7 = arith.constant 0 : index
    %10 = vector.load %arg4[%c0_6, %c0_7] : memref<64x16xbf16, #tpu.memory_space<vmem>>, vector<64x16xbf16>
    %cst_8 = arith.constant dense<0.000000e+00> : vector<8x16xf32>
    %11 = tpu.matmul %9, %10, %cst_8 {dimension_numbers = #tpu.dot_dimension_numbers<[1], [0], [0], [1], [0, 0, 1, 1], [], []>} : vector<8x64xbf16>, vector<64x16xbf16>, vector<8x16xf32> -> vector<8x16xf32>
    %c0_9 = arith.constant 0 : index
    %c0_10 = arith.constant 0 : index
    %12 = vector.load %arg5[%c0_9, %c0_10] : memref<1x16xf32, #tpu.memory_space<vmem>>, vector<1x16xf32>
    %13 = vector.broadcast %12 : vector<1x16xf32> to vector<8x16xf32>
    %14 = arith.addf %11, %13 : vector<8x16xf32>
    %cst_11 = arith.constant 0.000000e+00 : f32
    %15 = vector.broadcast %cst_11 : f32 to vector<8x16xf32>
    %16 = arith.maximumf %14, %15 : vector<8x16xf32>
    %c0_12 = arith.constant 0 : index
    %c0_13 = arith.constant 0 : index
    %17 = vector.load %arg6[%c0_12, %c0_13] : memref<1x16xf32, #tpu.memory_space<vmem>>, vector<1x16xf32>
    %18 = vector.broadcast %17 : vector<1x16xf32> to vector<8x16xf32>
    %19 = arith.mulf %16, %18 : vector<8x16xf32>
    %cst_14 = arith.constant dense<0.000000e+00> : vector<8xf32>
    %20 = vector.multi_reduction <add>, %19, %cst_14 [1] : vector<8x16xf32> to vector<8xf32>
    %21 = vector.shape_cast %20 : vector<8xf32> to vector<8x1xf32>
    %c0_15 = arith.constant 0 : index
    %c0_16 = arith.constant 0 : index
    %22 = memref.load %arg7[%c0_15, %c0_16] : memref<1x1xf32, #tpu.memory_space<smem>>
    %23 = vector.broadcast %22 : f32 to vector<8x1xf32>
    %24 = arith.addf %21, %23 : vector<8x1xf32>
    %cst_17 = arith.constant 0.000000e+00 : f32
    %25 = vector.broadcast %cst_17 : f32 to vector<8x1xf32>
    %26 = arith.subf %25, %24 : vector<8x1xf32>
    %27 = math.exp %26 : vector<8x1xf32>
    %cst_18 = arith.constant 1.000000e+00 : f32
    %28 = vector.broadcast %cst_18 : f32 to vector<8x1xf32>
    %29 = arith.addf %28, %27 : vector<8x1xf32>
    %30 = tpu.reciprocal %29 {approx = true} : vector<8x1xf32> -> vector<8x1xf32>
    %c0_19 = arith.constant 0 : index
    %c0_20 = arith.constant 0 : index
    %31 = vector.load %arg8[%c0_19, %c0_20] : memref<8x1xf32, #tpu.memory_space<vmem>>, vector<8x1xf32>
    tpu.vector_store %arg8[%c0_19, %c0_20], %30 {strides = array<i32>} : memref<8x1xf32, #tpu.memory_space<vmem>>, vector<8x1xf32>,
    return
  }
  func.func @transform_0(%arg0: i32) -> (i32, i32) {
    %c0_i32 = arith.constant 0 : i32
    %c0_i32_0 = arith.constant 0 : i32
    return %arg0, %c0_i32 : i32, i32
  }
  func.func @transform_1(%arg0: i32) -> (i32, i32) {
    %c0_i32 = arith.constant 0 : i32
    %c0_i32_0 = arith.constant 0 : i32
    %c0_i32_1 = arith.constant 0 : i32
    return %c0_i32, %c0_i32_0 : i32, i32
  }
  func.func @transform_2(%arg0: i32) -> (i32, i32) {
    %c0_i32 = arith.constant 0 : i32
    %c0_i32_0 = arith.constant 0 : i32
    %c0_i32_1 = arith.constant 0 : i32
    return %c0_i32, %c0_i32_0 : i32, i32
  }
  func.func @transform_3(%arg0: i32) -> (i32, i32) {
    %c0_i32 = arith.constant 0 : i32
    %c0_i32_0 = arith.constant 0 : i32
    %c0_i32_1 = arith.constant 0 : i32
    return %c0_i32, %c0_i32_0 : i32, i32
  }
  func.func @transform_4(%arg0: i32) -> (i32, i32) {
    %c0_i32 = arith.constant 0 : i32
    %c0_i32_0 = arith.constant 0 : i32
    %c0_i32_1 = arith.constant 0 : i32
    return %c0_i32, %c0_i32_0 : i32, i32
  }
  func.func @transform_5(%arg0: i32) -> (i32, i32) {
    %c0_i32 = arith.constant 0 : i32
    %c0_i32_0 = arith.constant 0 : i32
    %c0_i32_1 = arith.constant 0 : i32
    return %c0_i32, %c0_i32_0 : i32, i32
  }
  func.func @transform_6(%arg0: i32) -> (i32, i32) {
    %c0_i32 = arith.constant 0 : i32
    %c0_i32_0 = arith.constant 0 : i32
    %c0_i32_1 = arith.constant 0 : i32
    return %c0_i32, %c0_i32_0 : i32, i32
  }
  func.func @transform_7(%arg0: i32) -> (i32, i32) {
    %c0_i32 = arith.constant 0 : i32
    %c0_i32_0 = arith.constant 0 : i32
    return %arg0, %c0_i32 : i32, i32
  }
}

</mosaic_0001>

<bundles_post_ra>
// kernel: tpu_custom_call.1
= control target key start
LH: loop header
LB: loop body
LE: loop exit
PB: predicated region body
PF: predicated region fallthrough
CT: control target
= control target key end

     0   :  { %s915_s0 = inlined_call_operand.hbm [shape: f32[12,64], index: 0, kind: input, shape index: {}]   ;;  %s916_s1 = inlined_call_operand.vmem [shape: bf16[64,64], index: 1, kind: input, shape index: {}]   ;;  %s917_s2 = inlined_call_operand.vmem [shape: f32[1,64], index: 2, kind: input, shape index: {}]   ;;  %s918_s3 = inlined_call_operand.vmem [shape: bf16[64,16], index: 3, kind: input, shape index: {}]   ;;  %s919_s4 = inlined_call_operand.vmem [shape: f32[1,16], index: 4, kind: input, shape index: {}]   ;;  %s920_s5 = inlined_call_operand.vmem [shape: f32[1,16], index: 5, kind: input, shape index: {}]   ;;  %s921_s6 = inlined_call_operand.<no memory space> [shape: f32[1,1], index: 6, kind: input, shape index: {}]   ;;  %s922_s7 = inlined_call_operand.vmem [shape: f32[12,1], index: 7, kind: output, shape index: {}]  }
   0x1   :  { %12 = sst [smem:[#allocation2]] %s921_s6 }
   0x2   :  { %13 = vsyncpa [#allocation4], 0 }
   0x3   :  { %15 = vsyncpa [#allocation4 + $0x1], 0  ;;  %s775_s26 = smov 0   ;;  %s777_s27 = smov 0  }
   0x4   :  { %s779_s28 = smov 0   ;;  %s781_s29 = smov 0  }
   0x5 LB: > { %s794_s6 = sadd.s32 4294967295, %s727_s29   ;;  %s797_s30 = sadd.s32 1, %s727_s29   ;;  %s727_s29 = sphi %s781_s29, %s930_s29   ;;  %s723_s28 = sphi %s779_s28, %s929_s28   ;;  %s719_s27 = sphi %s777_s27, %s928_s27   ;;  %s715_s26 = sphi %s775_s26, %s927_s26  }
   0x6   : > { %s25_s8 = ssub.s32 %s727_s29, %s797_s30  ;;  %s28_s9 = sadd.s32 1, %s723_s28 }
   0x7   : > { %p26_p0 = scmp.eq.s32.totalorder %s25_s8, 0  ;;  %p35_p1 = scmp.ne.s32.totalorder %s723_s28, %s719_s27 }
   0x8   : > { %p36_p2 = scmp.eq.s32.totalorder %s727_s29, 0  ;;  %p41_p3 = scmp.ne.s32.totalorder %s719_s27, %s715_s26 }
   0x9   : > { %s807_s10 = scalar_select %p26_p0, %s723_s28, %s28_s9  }
   0xa   : > { %p37_p4 = por %p36_p2, %p35_p1  ;;  %p42_p5 = scmp.eq.s32.totalorder %s794_s6, 0 }
   0xb   : > { %p616_p6 = scmp.lt.s32.totalorder %s727_s29, 2  ;;  %s235_s12 = sand.u32 1, %s723_s28  }
   0xc   : > { %p811_p7 = por %p42_p5, %p41_p3  ;;  %s556_s13 = sshll.u32 %s235_s12, 3 }
   0xd   : > { %s557_s14 = sshll.u32 %s727_s29, 7  ;;  %s239_s18 = scalar_lea.vmem [#allocation3], %s556_s13 }
   0xe   : > { %s820_s17 = scalar_lea.hbm %s915_s0, %s557_s14  ;;  %s246_s19 = sshll.u32 %s239_s18, 4  ;;  %s822_s19 = int_to_ptr.vmem [resolvable:$true] %s246_s19 }
   0xf   : > { %p824_p8 = pnand %p616_p6, %p37_p4  ;;  %s236_s21 = scalar_lea.sflag [#allocation4], %s235_s12 }
  0x10   : > { %s663_s22 = scalar_lea.hbm %s820_s17, 128  ;;  %s668_s25 = scalar_lea.hbm %s915_s0, 256 }
  0x11   : > { %p664_p11 = scmp.ne.s32.totalorder %s820_s17, %s663_s22  ;;  %p665_p12 = pneg %p824_p8 }
  0x12   : > { %p669_p1 = scmp.lt.u32.totalorder %s820_s17, %s915_s0  ;;  %p670_p2 = scmp.lt.u32.totalorder %s668_s25, %s663_s22 }
  0x13   : > { %p666_p13 = pnand %p665_p12, %p664_p11  ;;  %p672_p4 = scmp.lt.u32.totalorder %s663_s22, %s820_s17 }
  0x14   : > { %p671_p3 = por %p670_p2, %p669_p1 }
  0x15   : > { %p667_p0 = pneg %p666_p13 }
  0x16   : > { %p673_p5 = por %p672_p4, %p671_p3 }
  0x18   : > { %p674_p6 = pnand %p673_p5, %p667_p0 }
  0x1a   : > { %677 = shalt.err (!%p674_p6)
}
  0x1b   : > { %s678_s9 = scalar_lea.vmem %s822_s19, 128  ;;  %s729_s12 = smov [#allocation3]  }
  0x1c   : > { %p679_p11 = scmp.ne.s32.totalorder %s822_s19, %s678_s9  ;;  %s683_s13 = sshll.u32 %s729_s12, 4  ;;  %s684_s13 = int_to_ptr.vmem [resolvable:$false] %s683_s13 }
  0x1d   : > { %s685_s14 = scalar_lea.vmem %s684_s13, 256  ;;  %p686_p10 = scmp.lt.s32.totalorder %s822_s19, %s684_s13 }
  0x1e   : > { %p681_p13 = pnand %p679_p11, %p665_p12  ;;  %p687_p1 = scmp.lt.s32.totalorder %s685_s14, %s678_s9 }
  0x20   : > { %p682_p9 = pneg %p681_p13  ;;  %p688_p2 = por %p687_p1, %p686_p10 }
  0x22   : > { %p689_p3 = pnand %p688_p2, %p682_p9 }
  0x24   : > { %692 = shalt.err (!%p689_p3)
}
  0x25   : > { %615 = dma.hbm_to_vmem [thread:$0]  (!%p824_p8), %s820_s17, 128, %s822_s19, %s236_s21  }
  0x26   : > { %p925_p0 = scmp.lt.s32.totalorder %s727_s29, 3  ;;  %p926_p4 = scmp.ge.s32.totalorder %s727_s29, 1 }
  0x28   : > { %p252_p12 = pnand %p926_p4, %p925_p0 }
  0x29   : > { %s257_s15 = sand.u32 (!%p252_p12), 1, %s719_s27  }
  0x2a   : > { %255 = sbr.rel (%p252_p12) target bundleno = 678 (0x2a6), region = 48  ;;  %s559_s16 = sshll.u32 (!%p252_p12), %s257_s15, 3 }
  0x2b   : > { %s258_s18 = scalar_lea.sflag (!%p252_p12), [#allocation4], %s257_s15  ;;  %s261_s22 = scalar_lea.vmem (!%p252_p12), [#allocation3], %s559_s16 }
  0x31   : > { %710 = dma.done.wait (%p811_p7), %s258_s18, 128  }
  0x32   : > { %712 = vsyncadd (%p811_p7), %s258_s18, 4294967168  ;;  %v730_v0 = vmov 0.0   ;;  %vm731_vm0 = vmmov 0   ;;  %v651_v1 = vld [vmem:[%s916_s1] sm:$0xff]   ;;  %v652_v2 = vld [vmem:[%s916_s1 + $0x8] sm:$0xff]   ;;  %vm337_vm1 = vcmask 523264  }
  0x33   : > { %586 = vmatprep.subr.bf16.mxu0 %v730_v0  ;;  %594 = vmatprep.mubr.msk.bf16.mxu0 %vm731_vm0, %v730_v0  ;;  %v655_v3 = vld [vmem:[%s918_s3] sm:$0xff]   ;;  %v653_v4 = vld [vmem:[%s916_s1 + $0x10] sm:$0xff]   ;;  %v656_v5 = vld [vmem:[%s918_s3 + $0x8] sm:$0xff]   ;;  %vm474_vm2 = vcmask 130048   ;;  %s478_s20 = sld [smem:[#allocation2]]  ;;  %p291_p7 = scmp.lt.s32.totalorder %s794_s6, 1 }
  0x34   : > { %598 = vmatprep.subr.bf16.mxu1 %v730_v0  ;;  %606 = vmatprep.mubr.msk.bf16.mxu1 %vm731_vm0, %v730_v0  ;;  %v654_v6 = vld [vmem:[%s916_s1 + $0x18] sm:$0xff]   ;;  %v296_v7 = vld [vmem:[%s261_s22] sm:$0xff]  ;;  %v657_v9 = vld [vmem:[%s918_s3 + $0x10] sm:$0xff]   ;;  %vm486_vm3 = vcmask 7168  }
  0x35   : > { %587 = vmatpush3.bf16.msra.mxu0 %v651_v1  ;;  %599 = vmatpush3.bf16.msra.mxu1 %v655_v3  ;;  %v297_v8 = vpack.c.bf16 %v296_v7, %v296_v7  ;;  %v658_v10 = vld [vmem:[%s918_s3 + $0x18] sm:$0xff]   ;;  %v561_v11 = vld [vmem:[%s917_s2] ss:$0 sm:$0xff]  ;;  %s932_s6 = smov (!%p291_p7, %s794_s6), 1 }
  0x36   : > { %588 = vmatprep.subr.bf16.mxu0 %v730_v0  ;;  %600 = vmatprep.subr.bf16.mxu1 %v730_v0  ;;  %v567_v19 = vld [vmem:[%s919_s4] ss:$0 sm:$0xff]  ;;  %s560_s21 = sshll.u32 %s932_s6, 3 }
  0x37   : > { %v573_v24 = vld [vmem:[%s920_s5] ss:$0 sm:$0xff]  ;;  %s294_s24 = scalar_lea.vmem %s922_s7, %s560_s21 }
  0x39   : > { %589 = vmatpush3.bf16.msra.mxu0 %v652_v2  ;;  %601 = vmatpush3.bf16.msra.mxu1 %v656_v5  ;;  %v479_v29 = vstv %s478_s20 }
  0x3a   : > { %590 = vmatprep.subr.bf16.mxu0 %v730_v0  ;;  %602 = vmatprep.subr.bf16.mxu1 %v730_v0 }
  0x3d   : > { %591 = vmatpush3.bf16.msra.mxu0 %v653_v4  ;;  %603 = vmatpush3.bf16.msra.mxu1 %v657_v9 }
  0x3e   : > { %592 = vmatprep.subr.bf16.mxu0 %v730_v0  ;;  %604 = vmatprep.subr.bf16.mxu1 %v730_v0 }
  0x41   : > { %593 = vmatpush3.bf16.msra.mxu0 %v654_v6  ;;  %605 = vmatpush3.bf16.msra.mxu1 %v658_v10 }
  0x44   : > { %595 = vmatmul.mubr.msk.bf16.vlgmr.msra.gmra.mrb[0].mxu0 %vm337_vm1, %v297_v8 }
 0x117   : > { %v375_v12 = vpop.f32.mrb[0].mxu0 }
 0x118   : > { %v376_v13 = vadd.f32 %v561_v11, %v375_v12  ;;  %v596_v14 = vpop.f32.mrb[1].mxu0 }
 0x119   : > { %v378_v15 = vpop.f32.mrb[2].mxu0 }
 0x11a   : > { %v381_v16 = vmax.f32 %v376_v13, 0.0  ;;  %v597_v17 = vpop.f32.mrb[3].mxu0 }
 0x11c   : > { %v382_v18 = vpack.c.bf16 %v381_v16, %v381_v16 }
 0x11e   : > { %607 = vmatmul.mubr.msk.bf16.vlgmr.msra.gmra.mrb[0].mxu1 %vm337_vm1, %v382_v18 }
 0x1f1   : > { %v459_v20 = vpop.f32.mrb[0].mxu1 }
 0x1f2   : > { %v460_v21 = vadd.f32 %v567_v19, %v459_v20  ;;  %v608_v22 = vpop.f32.mrb[1].mxu1 }
 0x1f3   : > { %v462_v23 = vpop.f32.mrb[2].mxu1 }
 0x1f4   : > { %v465_v25 = vmax.f32 %v460_v21, 0.0  ;;  %v609_v26 = vpop.f32.mrb[3].mxu1 }
 0x1f6   : > { %v473_v27 = vmul.f32 %v573_v24, %v465_v25 }
 0x1f8   : > { %v475_v28 = vsel %vm474_vm2, %v473_v27, 0.0 }
 0x1f9   : > { %476 = vadd.xlane.f32.xlu0 %v475_v28 }
 0x286   : > { %v477_v30 = vpop.xlane.xlu0 %476 }
 0x287   : > { %v480_v31 = vadd.f32 %v479_v29, %v477_v30 }
 0x289   : > { %v481_v32 = vsub.f32 0.0, %v480_v31 }
 0x28b   : > { %v482_v33 = vmul.f32 1.442695, %v481_v32 }
 0x28d   : > { %659 = vpow2.f32 %v482_v33 }
 0x297   : > { %v660_v34 = vpop.eup %659 }
 0x298   : > { %v484_v35 = vadd.f32 1.0, %v660_v34 }
 0x29a   : > { %661 = vrcp.f32 %v484_v35 }
 0x2a4   : > { %v662_v36 = vpop.eup %661 }
 0x2a5   : > { %487 = vst.msk [vmem:[%s294_s24] sm:$0xff] %vm486_vm3, %v662_v36 }
 0x2a6 PF: > { %p18_p8 = scmp.ge.s32.totalorder %s797_s30, 4   ;;  %s927_s26 = smov %s719_s27 }
 0x2a7   : > { %s928_s27 = smov %s723_s28  ;;  %s929_s28 = smov %s807_s10 }
 0x2a8   : > { %s930_s29 = smov %s797_s30  ;;  %20 = sbr.rel (!%p18_p8) target bundleno = 5 (0x5), region = 88 }
 0x2af   :  { %507 = vsyncpa [#allocation4], 1 }
 0x2b0   :  { %509 = vsyncpa [#allocation4 + $0x1], 1 }

</bundles_post_ra>
